<compile_context>
chip_gen: v7x
topology: tpu7x:2x2x1
jax: 0.10.0
libtpu: 0.0.40
codegen_flags: <defaults>
</compile_context>

<pallas_src>
import functools

import jax
import jax.numpy as jnp
from jax.experimental import pallas as pl
from jax.experimental.pallas import tpu as pltpu


def _ls_ce_kernel(logits_ref, target_ref, out_ref, *, smoothing, total_n, row_tile):
    i = pl.program_id(0)

    x = logits_ref[...]                                       # (TN, C), native dtype
    tn, c = x.shape
    t = target_ref[...]                                       # (TN, 1) int32 (per-tile)

    # (1, C) column iota; broadcasting inside ==/where avoids a (TN, C) int32 temp.
    cols = jax.lax.broadcasted_iota(jnp.int32, (1, c), 1)

    # Four fused single-pass reductions over x (casts fuse into each pass; the
    # shifted/exp intermediate is consumed by its reduction, never kept live).
    m = jnp.max(x, axis=-1, keepdims=True).astype(jnp.float32)           # (TN, 1)
    sum_x = jnp.sum(x.astype(jnp.float32), axis=-1, keepdims=True)       # (TN, 1)
    exp_sum = jnp.sum(jnp.exp(x.astype(jnp.float32) - m),
                      axis=-1, keepdims=True)                            # (TN, 1)
    x_tgt = jnp.sum(jnp.where(cols == t, x.astype(jnp.float32), 0.0),
                    axis=-1, keepdims=True)                              # (TN, 1)

    lse = jnp.log(exp_sum)                                               # (TN, 1)

    # sum_c log_prob = sum_c(x) - C*m - C*lse ; log_prob[target] = x[tgt] - m - lse
    sum_log_prob = sum_x - jnp.float32(c) * (m + lse)
    log_prob_tgt = x_tgt - m - lse

    row_loss = (-jnp.float32(smoothing / c) * sum_log_prob
                - jnp.float32(1.0 - smoothing) * log_prob_tgt)           # (TN, 1)

    # Mask rows past the real N (select, so NaN/Inf from the stale rows of the last,
    # partially out-of-bounds block are dropped) BEFORE summing the block.
    row_ids = i * row_tile + jax.lax.broadcasted_iota(jnp.int32, (tn, 1), 0)
    block_sum = jnp.sum(jnp.where(row_ids < total_n, row_loss, 0.0))     # scalar

    # Lane-dense single-vreg store: partial sum at [0, 0], zeros elsewhere.
    zero_pos = ((jax.lax.broadcasted_iota(jnp.int32, (8, 128), 0) == 0)
                & (jax.lax.broadcasted_iota(jnp.int32, (8, 128), 1) == 0))
    out_ref[...] = jnp.where(zero_pos, block_sum, 0.0)


def label_smoothing_cross_entropy(logits, target, *, smoothing=0.1, row_tile=None,
                                  block_bytes=2 << 20):
    """logits: (N, C) float (f32 or bf16), target: (N,) int -> scalar f32 loss."""
    n, c = logits.shape
    itemsize = jnp.dtype(logits.dtype).itemsize

    if row_tile is None:
        # ~block_bytes of logits (native dtype) per block, in multiples of 8 rows.
        # TODO(synk): for vocab-scale C (8*C*itemsize > block_bytes) add a second
        # "arbitrary" grid axis over C with an online logsumexp so row tiles can stay
        # large under v7x's 64 MiB per-TC VMEM instead of collapsing to 8 rows.
        rows = max(8, (block_bytes // max(1, c * itemsize)) // 8 * 8)
        # Cap the tile so the grid has >= 8 steps when N allows it (megacore + pipeline).
        min_blocks = 8
        cap = max(8, (n // min_blocks) // 8 * 8) if n >= min_blocks * 8 else 8
        row_tile = min(rows, cap)
    else:
        row_tile = max(8, -(-row_tile // 8) * 8)     # round up to a multiple of 8

    num_blocks = pl.cdiv(n, row_tile)
    padded_n = num_blocks * row_tile

    target2d = target.astype(jnp.int32).reshape(n, 1)
    if padded_n != n:
        target2d = jnp.pad(target2d, ((0, padded_n - n), (0, 0)))

    kernel = functools.partial(_ls_ce_kernel, smoothing=float(smoothing),
                               total_n=n, row_tile=row_tile)

    partial_sums = pl.pallas_call(
        kernel,
        out_shape=jax.ShapeDtypeStruct((num_blocks * 8, 128), jnp.float32),
        grid_spec=pltpu.PrefetchScalarGridSpec(
            num_scalar_prefetch=0,
            grid=(num_blocks,),
            in_specs=[
                pl.BlockSpec((row_tile, c), lambda i: (i, 0)),   # streamed logits
                pl.BlockSpec((row_tile, 1), lambda i: (i, 0)),   # per-tile targets
            ],
            out_specs=pl.BlockSpec((8, 128), lambda i: (i, 0)),  # disjoint per step
        ),
        compiler_params=pltpu.CompilerParams(
            dimension_semantics=("parallel",),   # disjoint output blocks -> 2-TC safe
            vmem_limit_bytes=40 * 1024 * 1024,
        ),
    )(logits, target2d)

    return jnp.sum(partial_sums) / jnp.float32(n)


def _reference(logits, target, smoothing=0.1):
    n, c = logits.shape
    log_prob = jax.nn.log_softmax(logits.astype(jnp.float32), axis=-1)
    weight = jnp.full((n, c), smoothing / c, dtype=jnp.float32)
    weight = weight.at[jnp.arange(n), target].set(1.0 - smoothing + smoothing / c)
    return jnp.mean(jnp.sum(-weight * log_prob, axis=-1))


if __name__ == "__main__":
    key = jax.random.PRNGKey(0)
    k1, k2 = jax.random.split(key)

    # N deliberately not a multiple of the tile to exercise the last-block row mask.
    N, C = 50, 96
    smoothing = 0.1
    logits = jax.random.normal(k1, (N, C), dtype=jnp.float32)
    target = jax.random.randint(k2, (N,), 0, C, dtype=jnp.int32)

    loss = label_smoothing_cross_entropy(logits, target, smoothing=smoothing)
    loss = jax.block_until_ready(loss)

    ref = _reference(logits, target, smoothing)
    assert jnp.allclose(loss, ref, atol=1e-5, rtol=1e-5), (loss, ref)

    print("KERNEL_OK")
</pallas_src>

<mosaic_0001>
module attributes {stable_mosaic.version = 11 : i64} {
  func.func @_ls_ce_kernel(%arg0: i32, %arg1: memref<8x96xf32, #tpu.memory_space<vmem>>, %arg2: memref<8x1xi32, #tpu.memory_space<vmem>>, %arg3: memref<8x128xf32, #tpu.memory_space<vmem>>) attributes {dimension_semantics = [#tpu.dimension_semantics<parallel>], iteration_bounds = array<i64: 7>, scalar_prefetch = 0 : i64, scratch_operands = 0 : i64, tpu.core_type = #tpu.core_type<tc>, window_params = [{transform_indices = @transform_0, window_bounds = array<i64: 8, 96>}, {transform_indices = @transform_1, window_bounds = array<i64: 8, 1>}, {transform_indices = @transform_2, window_bounds = array<i64: 8, 128>}]} {
    %c0 = arith.constant 0 : index
    %c0_0 = arith.constant 0 : index
    %0 = vector.load %arg1[%c0, %c0_0] : memref<8x96xf32, #tpu.memory_space<vmem>>, vector<8x96xf32>
    %c0_1 = arith.constant 0 : index
    %c0_2 = arith.constant 0 : index
    %1 = vector.load %arg2[%c0_1, %c0_2] : memref<8x1xi32, #tpu.memory_space<vmem>>, vector<8x1xi32>
    %2 = tpu.iota {dimensions = array<i32: 1>} : vector<1x96xi32>
    %cst = arith.constant dense<0xFF800000> : vector<8xf32>
    %3 = vector.multi_reduction <maximumf>, %0, %cst [1] : vector<8x96xf32> to vector<8xf32>
    %4 = vector.shape_cast %3 : vector<8xf32> to vector<8x1xf32>
    %cst_3 = arith.constant dense<0.000000e+00> : vector<8xf32>
    %5 = vector.multi_reduction <add>, %0, %cst_3 [1] : vector<8x96xf32> to vector<8xf32>
    %6 = vector.shape_cast %5 : vector<8xf32> to vector<8x1xf32>
    %7 = vector.broadcast %4 : vector<8x1xf32> to vector<8x96xf32>
    %8 = arith.subf %0, %7 : vector<8x96xf32>
    %9 = math.exp %8 : vector<8x96xf32>
    %cst_4 = arith.constant dense<0.000000e+00> : vector<8xf32>
    %10 = vector.multi_reduction <add>, %9, %cst_4 [1] : vector<8x96xf32> to vector<8xf32>
    %11 = vector.shape_cast %10 : vector<8xf32> to vector<8x1xf32>
    %12 = vector.broadcast %2 : vector<1x96xi32> to vector<8x96xi32>
    %13 = vector.broadcast %1 : vector<8x1xi32> to vector<8x96xi32>
    %14 = arith.cmpi eq, %12, %13 : vector<8x96xi32>
    %cst_5 = arith.constant 0.000000e+00 : f32
    %15 = vector.broadcast %cst_5 : f32 to vector<8x96xf32>
    %16 = arith.select %14, %0, %15 : vector<8x96xi1>, vector<8x96xf32>
    %cst_6 = arith.constant dense<0.000000e+00> : vector<8xf32>
    %17 = vector.multi_reduction <add>, %16, %cst_6 [1] : vector<8x96xf32> to vector<8xf32>
    %18 = vector.shape_cast %17 : vector<8xf32> to vector<8x1xf32>
    %19 = math.log %11 : vector<8x1xf32>
    %20 = arith.addf %4, %19 : vector<8x1xf32>
    %cst_7 = arith.constant 9.600000e+01 : f32
    %21 = vector.broadcast %cst_7 : f32 to vector<8x1xf32>
    %22 = arith.mulf %21, %20 : vector<8x1xf32>
    %23 = arith.subf %6, %22 : vector<8x1xf32>
    %24 = arith.subf %18, %4 : vector<8x1xf32>
    %25 = arith.subf %24, %19 : vector<8x1xf32>
    %cst_8 = arith.constant 0.000000e+00 : f32
    %cst_9 = arith.constant 0.00104166672 : f32
    %26 = arith.subf %cst_8, %cst_9 : f32
    %27 = vector.broadcast %26 : f32 to vector<8x1xf32>
    %28 = arith.mulf %27, %23 : vector<8x1xf32>
    %cst_10 = arith.constant 0.899999976 : f32
    %29 = vector.broadcast %cst_10 : f32 to vector<8x1xf32>
    %30 = arith.mulf %29, %25 : vector<8x1xf32>
    %31 = arith.subf %28, %30 : vector<8x1xf32>
    %c8_i32 = arith.constant 8 : i32
    %32 = arith.muli %arg0, %c8_i32 : i32
    %33 = tpu.iota {dimensions = array<i32: 0>} : vector<8x1xi32>
    %34 = vector.broadcast %32 : i32 to vector<8x1xi32>
    %35 = arith.addi %34, %33 : vector<8x1xi32>
    %c50_i32 = arith.constant 50 : i32
    %36 = vector.broadcast %c50_i32 : i32 to vector<8x1xi32>
    %37 = arith.cmpi slt, %35, %36 : vector<8x1xi32>
    %cst_11 = arith.constant 0.000000e+00 : f32
    %38 = vector.broadcast %cst_11 : f32 to vector<8x1xf32>
    %39 = arith.select %37, %31, %38 : vector<8x1xi1>, vector<8x1xf32>
    %40 = vector.shape_cast %39 : vector<8x1xf32> to vector<1x8x1xf32>
    %cst_12 = arith.constant dense<0.000000e+00> : vector<1xf32>
    %41 = vector.multi_reduction <add>, %40, %cst_12 [1, 2] : vector<1x8x1xf32> to vector<1xf32>
    %42 = vector.shape_cast %41 : vector<1xf32> to vector<1x1x1xf32>
    %43 = vector.extract %42[0, 0, 0] : f32 from vector<1x1x1xf32>
    %44 = tpu.iota {dimensions = array<i32: 0>} : vector<8x128xi32>
    %c0_i32 = arith.constant 0 : i32
    %45 = vector.broadcast %c0_i32 : i32 to vector<8x128xi32>
    %46 = arith.cmpi eq, %44, %45 : vector<8x128xi32>
    %47 = tpu.iota {dimensions = array<i32: 1>} : vector<8x128xi32>
    %c0_i32_13 = arith.constant 0 : i32
    %48 = vector.broadcast %c0_i32_13 : i32 to vector<8x128xi32>
    %49 = arith.cmpi eq, %47, %48 : vector<8x128xi32>
    %50 = arith.andi %46, %49 : vector<8x128xi1>
    %cst_14 = arith.constant 0.000000e+00 : f32
    %51 = vector.broadcast %43 : f32 to vector<8x128xf32>
    %52 = vector.broadcast %cst_14 : f32 to vector<8x128xf32>
    %53 = arith.select %50, %51, %52 : vector<8x128xi1>, vector<8x128xf32>
    %c0_15 = arith.constant 0 : index
    %c0_16 = arith.constant 0 : index
    %54 = vector.load %arg3[%c0_15, %c0_16] : memref<8x128xf32, #tpu.memory_space<vmem>>, vector<8x128xf32>
    tpu.vector_store %arg3[%c0_15, %c0_16], %53 {strides = array<i32>} : memref<8x128xf32, #tpu.memory_space<vmem>>, vector<8x128xf32>,
    return
  }
  func.func @transform_0(%arg0: i32) -> (i32, i32) {
    %c0_i32 = arith.constant 0 : i32
    %c0_i32_0 = arith.constant 0 : i32
    return %arg0, %c0_i32 : i32, i32
  }
  func.func @transform_1(%arg0: i32) -> (i32, i32) {
    %c0_i32 = arith.constant 0 : i32
    %c0_i32_0 = arith.constant 0 : i32
    return %arg0, %c0_i32 : i32, i32
  }
  func.func @transform_2(%arg0: i32) -> (i32, i32) {
    %c0_i32 = arith.constant 0 : i32
    %c0_i32_0 = arith.constant 0 : i32
    return %arg0, %c0_i32 : i32, i32
  }
}

</mosaic_0001>

<bundles_post_ra>
// kernel: tpu_custom_call.1
= control target key start
LH: loop header
LB: loop body
LE: loop exit
PB: predicated region body
PF: predicated region fallthrough
CT: control target
= control target key end

     0   :  { %7 = vsyncpa [#allocation3], 0  ;;  %s548_s0 = inlined_call_operand.vmem [shape: f32[50,96], index: 0, kind: input, shape index: {}]   ;;  %s549_s1 = inlined_call_operand.vmem [shape: s32[56,1], index: 1, kind: input, shape index: {}]   ;;  %s550_s2 = inlined_call_operand.hbm [shape: f32[56,128], index: 2, kind: output, shape index: {}]  }
   0x1   :  { %9 = vsyncpa [#allocation3 + $0x1], 0  ;;  %s440_s9 = smov 0   ;;  %s442_s10 = smov 0  }
   0x2   :  { %s444_s11 = smov 0   ;;  %s446_s12 = smov 0  }
   0x3 LB: > { %s461_s13 = sadd.s32 4294967295, %s421_s12   ;;  %s300_s14 = sadd.s32 4294967294, %s421_s12   ;;  %s421_s12 = sphi %s446_s12, %s556_s12   ;;  %s417_s11 = sphi %s444_s11, %s555_s11   ;;  %s413_s10 = sphi %s442_s10, %s554_s10   ;;  %s409_s9 = sphi %s440_s9, %s553_s9  }
   0x4   : > { %s465_s15 = sadd.s32 1, %s421_s12   ;;  %s74_s16 = sadd.s32 1, %s417_s11 }
   0x5   : > { %s71_s17 = ssub.s32 %s421_s12, %s465_s15  ;;  %p84_p0 = scmp.ne.s32.totalorder %s417_s11, %s413_s10 }
   0x6   : > { %p72_p1 = scmp.eq.s32.totalorder %s71_s17, 0  ;;  %p85_p2 = scmp.eq.s32.totalorder %s461_s13, 6 }
   0x7   : > { %p90_p3 = scmp.ne.s32.totalorder %s413_s10, %s409_s9  ;;  %p91_p4 = scmp.eq.s32.totalorder %s300_s14, 6 }
   0x8   : > { %s476_s18 = scalar_select %p72_p1, %s417_s11, %s74_s16  }
   0x9   : > { %p478_p5 = por %p85_p2, %p84_p0  ;;  %p482_p6 = por %p91_p4, %p90_p3 }
   0xa   : > { %p303_p7 = scmp.ge.s32.totalorder %s421_s12, 1  ;;  %p123_p8 = scmp.lt.s32.totalorder %s421_s12, 8 }
   0xc   : > { %p124_p9 = pnand %p303_p7, %p123_p8 }
   0xd   : > { %p148_p10 = scmp.lt.s32.totalorder (!%p124_p9), %s461_s13, 6  ;;  %v423_v0 = vmov (!%p124_p9), 0   ;;  %vm160_vm0 = vcmask (!%p124_p9), 785408   ;;  %v158_v7 = vlaneseq (!%p124_p9)  ;;  %s307_s29 = sshll.u32 (!%p124_p9), %s461_s13, 3  ;;  %vm198_vm3 = vcmask (!%p124_p9), 7168  }
   0xe   : > { %127 = sbr.rel (%p124_p9) target bundleno = 572 (0x23c), region = 28  ;;  %354 = vset.pattern.permute.xlu0 (!%p124_p9), %v423_v0  ;;  %v194_v22 = vstv (!%p124_p9), %s307_s29  ;;  %s145_s30 = sand.u32 (!%p124_p9), 1, %s413_s10  }
   0xf   : > { %v159_v8 = vand.u32 (!%p124_p9), 127, %v158_v7  ;;  %v193_v19 = vshrl.u32 (!%p124_p9), %v158_v7, 7  ;;  %s304_s3 = sshll.u32 (!%p124_p9), %s145_s30, 3  ;;  %s309_s4 = sshll.u32 (!%p124_p9), %s461_s13, 7 }
  0x10   : > { %s147_s5 = scalar_lea.vmem (!%p124_p9), [#allocation2], %s304_s3  ;;  %s506_s16 = scalar_lea.hbm (!%p124_p9), %s550_s2, %s309_s4 }
  0x11   : > { %v195_v26 = vadd.s32 (!%p124_p9), %v194_v22, %v193_v19  ;;  %vm209_vm4 = vcmp.eq.s32.totalorder (!%p124_p9), %v193_v19, 0  ;;  %vm210_vm5 = vcmp.eq.s32.totalorder (!%p124_p9), %v159_v8, 0  ;;  %s229_s6 = sshll.u32 (!%p124_p9), %s147_s5, 4  ;;  %s216_s17 = scalar_lea.sflag (!%p124_p9), [#allocation3], %s145_s30  ;;  %s508_s6 = int_to_ptr.vmem [resolvable:$true] %s229_s6 }
  0x12   : > { %vm211_vm6 = vmand (!%p124_p9), %vm209_vm4, %vm210_vm5 }
  0x13   : > { %vm196_vm2 = vcmp.lt.s32.totalorder (!%p124_p9), %v195_v26, 50 }
  0x15   : > { %s149_s21 = scalar_select %p148_p10, %s461_s13, 6 }
  0x16   : > { %s424_s13 = smov [#allocation2]  }
  0x17   : > { %s305_s22 = sshll.u32 %s149_s21, 3  ;;  %s359_s21 = scalar_lea.vmem %s508_s6, 128 }
  0x18   : > { %s151_s25 = scalar_lea.vmem %s548_s0, %s305_s22  ;;  %s155_s28 = scalar_lea.vmem %s549_s1, %s305_s22 }
  0x19   : > { %v156_v1 = vld [vmem:[%s151_s25] sm:$0xff]  ;;  %p360_p11 = scmp.ne.s32.totalorder %s508_s6, %s359_s21  ;;  %s363_s22 = sshll.u32 %s424_s13, 4  ;;  %s364_s22 = int_to_ptr.vmem [resolvable:$false] %s363_s22 }
  0x1a   : > { %v161_v2 = vsel %vm160_vm0, %v156_v1, -inf  ;;  %v157_v3 = vld [vmem:[%s155_s28] sm:$0xff]  ;;  %v164_v14 = vsel %vm160_vm0, %v156_v1, 0.0  ;;  %s365_s23 = scalar_lea.vmem %s364_s22, 256  ;;  %p366_p0 = scmp.lt.s32.totalorder %s508_s6, %s364_s22 }
  0x1b   : > { %162 = vmax.xlane.f32.xlu0 %v161_v2  ;;  %p361_p12 = pnand %p360_p11, %p478_p5  ;;  %p367_p1 = scmp.lt.s32.totalorder %s365_s23, %s359_s21 }
  0x1d   : > { %p362_p13 = pneg %p361_p12  ;;  %p368_p2 = por %p367_p1, %p366_p0 }
  0x1f   : > { %p369_p3 = pnand %p368_p2, %p362_p13 }
  0x31   : > { %174 = vperm.xlu0 %354, %v157_v3  }
  0xa8   : > { %v163_v4 = vpop.xlane.xlu0 %162 }
  0xa9   : > { %v167_v5 = vsub.f32 %v156_v1, %v163_v4 }
  0xab   : > { %v168_v6 = vmul.f32 1.442695, %v167_v5 }
  0xad   : > { %355 = vpow2.f32 %v168_v6 }
  0xb0   : > { %v175_v9 = vpop.permute.xlu0 %174 }
  0xb1   : > { %vm176_vm1 = vcmp.eq.s32.totalorder %v159_v8, %v175_v9 }
  0xb2   : > { %v177_v11 = vsel %vm176_vm1, %v156_v1, 0.0 }
  0xb3   : > { %v178_v13 = vsel %vm160_vm0, %v177_v11, 0.0 }
  0xb7   : > { %v356_v10 = vpop.eup %355 }
  0xb8   : > { %v170_v12 = vsel %vm160_vm0, %v356_v10, 0.0 }
  0xb9   : > { %171 = vadd.xlane.f32.xlu1 %v170_v12 }
  0xbd   : > { %179 = vadd.xlane.f32.xlu1 %v178_v13 }
  0xc1   : > { %165 = vadd.xlane.f32.xlu1 %v164_v14 }
 0x146   : > { %v172_v15 = vpop.xlane.xlu1 %171 }
 0x147   : > { %357 = vlog2.f32 %v172_v15 }
 0x14a   : > { %v180_v17 = vpop.xlane.xlu1 %179 }
 0x14b   : > { %v186_v20 = vsub.f32 %v180_v17, %v163_v4 }
 0x14e   : > { %v166_v23 = vpop.xlane.xlu1 %165 }
 0x151   : > { %v358_v16 = vpop.eup %357 }
 0x152   : > { %v182_v18 = vmul.f32 0.6931472, %v358_v16 }
 0x154   : > { %v183_v21 = vadd.f32 %v182_v18, %v163_v4  ;;  %v187_v24 = vsub.f32 %v186_v20, %v182_v18 }
 0x156   : > { %v184_v25 = vmul.f32 96.0, %v183_v21  ;;  %v189_v28 = vmul.f32 0.9, %v187_v24 }
 0x158   : > { %v185_v27 = vsub.f32 %v166_v23, %v184_v25 }
 0x15a   : > { %v188_v29 = vmul.f32 -0.0010416667, %v185_v27 }
 0x15c   : > { %v190_v30 = vsub.f32 %v188_v29, %v189_v28 }
 0x15e   : > { %v197_v31 = vsel %vm196_vm2, %v190_v30, 0.0 }
 0x15f   : > { %v199_v32 = vsel %vm198_vm3, %v197_v31, 0.0 }
 0x160   : > { %200 = vadd.xlane.f32.xlu1 %v199_v32 }
 0x1ed   : > { %v201_v33 = vpop.xlane.xlu1 %200 }
 0x1ee   : > { %v202_v34 = vrot.slane %v201_v33, 4 }
 0x1f0   : > { %v203_v35 = vadd.f32 %v202_v34, %v201_v33 }
 0x1f2   : > { %v204_v36 = vrot.slane %v203_v35, 2 }
 0x1f4   : > { %v205_v37 = vadd.f32 %v204_v36, %v203_v35 }
 0x1f6   : > { %v206_v38 = vrot.slane %v205_v37, 1 }
 0x1f8   : > { %v207_v39 = vadd.f32 %v206_v38, %v205_v37 }
 0x1fa   : > { %312 = vpush %v207_v39 }
 0x22b   : > { %s313_s7 = spop %312 }
 0x22c   : > { %v212_v40 = vstv %s313_s7 }
 0x22d   : > { %v213_v41 = vsel %vm211_vm6, %v212_v40, 0.0 }
 0x22e   : > { %214 = vst [vmem:[%s147_s5] sm:$0xff] %v213_v41 }
 0x22f   : > { %372 = shalt.err (!%p369_p3)
}
 0x230   : > { %s373_s24 = scalar_lea.hbm %s506_s16, 128  ;;  %s377_s27 = scalar_lea.hbm %s550_s2, 896 }
 0x231   : > { %p374_p4 = scmp.ne.s32.totalorder %s506_s16, %s373_s24  ;;  %p378_p9 = scmp.lt.u32.totalorder %s506_s16, %s550_s2 }
 0x232   : > { %p379_p10 = scmp.lt.u32.totalorder %s377_s27, %s373_s24  ;;  %p381_p12 = scmp.lt.u32.totalorder %s373_s24, %s506_s16 }
 0x233   : > { %p375_p7 = pnand %p374_p4, %p478_p5 }
 0x234   : > { %p380_p11 = por %p379_p10, %p378_p9 }
 0x235   : > { %p376_p8 = pneg %p375_p7 }
 0x236   : > { %p382_p13 = por %p381_p12, %p380_p11 }
 0x238   : > { %p383_p0 = pnand %p382_p13, %p376_p8 }
 0x23a   : > { %386 = shalt.err (!%p383_p0)
}
 0x23b   : > { %314 = dma.vmem_to_hbm [thread:$0]  (%p478_p5), %s508_s6, 128, %s506_s16, %s216_s17  }
 0x23c PF: > { %p320_p1 = scmp.ge.s32.totalorder %s421_s12, 2  ;;  %s241_s30 = sand.u32 1, %s409_s9  }
 0x23d   : > { %s242_s3 = scalar_lea.sflag [#allocation3], %s241_s30 }
 0x23e   : > { %p317_p2 = pnand %p320_p1, %p482_p6 }
 0x240   : > { %404 = dma.done.wait (!%p317_p2), %s242_s3, 128  }
 0x241   : > { %406 = vsyncadd (!%p317_p2), %s242_s3, 4294967168  ;;  %p12_p3 = scmp.ge.s32.totalorder %s465_s15, 9   ;;  %s553_s9 = smov %s413_s10 }
 0x242   : > { %s554_s10 = smov %s417_s11  ;;  %s555_s11 = smov %s476_s18 }
 0x243   : > { %s556_s12 = smov %s465_s15  ;;  %14 = sbr.rel (!%p12_p3) target bundleno = 3 (0x3), region = 66 }
 0x24a   :  { %247 = vsyncpa [#allocation3], 1 }
 0x24b   :  { %249 = vsyncpa [#allocation3 + $0x1], 1 }

</bundles_post_ra>
